<compile_context>
chip_gen: v7x
topology: tpu7x:2x2x1
jax: 0.10.0
libtpu: 0.0.40
codegen_flags: <defaults>
</compile_context>

<pallas_src>
import functools

import jax
import jax.numpy as jnp
from jax.experimental import pallas as pl
from jax.experimental.pallas import tpu as pltpu


def _round_up(x, m):
    return ((x + m - 1) // m) * m


def _patch_embed_kernel(x_ref, w_ref, b_ref, o_ref):
    # x_ref: (TM, K_pad)  bf16 im2col patch rows
    # w_ref: (TN, K_pad)  bf16 projection weight (natural Conv2d (out, C*P*P) layout)
    # b_ref: (1, TN)      f32 bias
    # o_ref: (TM, TN)     output tile (f32 or bf16)
    acc = jax.lax.dot_general(
        x_ref[...], w_ref[...],
        dimension_numbers=(((1,), (1,)), ((), ())),   # contract K with K (w kept (N, K))
        preferred_element_type=jnp.float32,
    )
    o_ref[...] = (acc + b_ref[...]).astype(o_ref.dtype)


@functools.partial(jax.jit, static_argnums=(3, 4))
def patch_embeddings(x, weight, bias, patch_size, out_dtype=jnp.float32):
    """
    x:      (B, C, H, W)  float32  (NCHW, like PyTorch)
    weight: (hidden, C, P, P)      (PyTorch Conv2d weight layout)
    bias:   (hidden,)
    returns (B, num_patches, hidden) in out_dtype (default float32)
    """
    B, C, H, W = x.shape
    P = patch_size
    N = weight.shape[0]
    nph, npw = H // P, W // P
    num_patches = nph * npw
    K = C * P * P
    M = B * num_patches

    # ---- glue: bf16 upstream cast, then im2col (feature order (C, ph, pw) matches
    #      the flattened conv weight).  Fully fusing this reorder into the kernel
    #      needs multi-axis VMEM relayouts whose Mosaic lowering is not guaranteed,
    #      so it stays in XLA where it fuses under jit.
    xb = x.astype(jnp.bfloat16)
    patches = xb.reshape(B, C, nph, P, npw, P)
    patches = jnp.transpose(patches, (0, 2, 4, 1, 3, 5)).reshape(M, K)

    # ---- pad K (MXU contraction / lane dim) and N (output lane dim) to 128
    K_pad = _round_up(K, 128)
    N_pad = _round_up(N, 128)

    # ---- tile sizes
    if M >= 1024:
        TM = 512                                       # amortize ~0.35us/step grid overhead
    elif M >= 512:
        TM = 256
    else:
        # small-M: aim for >= 2 M-tiles; multiple of 16 for bf16 sublane packing
        TM = max(16, _round_up(max(M // 2, 16), 16))
    M_pad = _round_up(M, TM)

    if N_pad <= 1024:
        TN = N_pad                                     # whole hidden: weight DMA'd once, resident
    else:
        TN = 128
        for cand in (512, 384, 256):                   # largest 128-multiple divisor, capped
            if N_pad % cand == 0:
                TN = cand
                break

    # ---- single fused pad per operand (M+K pads together; N+K pads together)
    if (M_pad != M) or (K_pad != K):
        patches = jnp.pad(patches, ((0, M_pad - M), (0, K_pad - K)))
    w_mat = weight.reshape(N, K).astype(jnp.bfloat16)  # no transpose materialized
    if (N_pad != N) or (K_pad != K):
        w_mat = jnp.pad(w_mat, ((0, N_pad - N), (0, K_pad - K)))
    b_vec = bias.astype(jnp.float32)
    if N_pad != N:
        b_vec = jnp.pad(b_vec, (0, N_pad - N))
    b_mat = b_vec.reshape(1, N_pad)

    m_steps = M_pad // TM
    n_steps = N_pad // TN

    if n_steps == 1:
        # Common case (hidden <= 1024): 1-D grid over M.  Weight/bias block index is
        # constant -> DMA'd once and VMEM-resident; the parallel axis is the long M
        # axis, so v7x's megacore split is balanced.
        grid = (m_steps,)
        in_specs = [
            pl.BlockSpec((TM, K_pad), lambda i: (i, 0)),   # patch rows: march over M
            pl.BlockSpec((TN, K_pad), lambda i: (0, 0)),   # weight: resident
            pl.BlockSpec((1, TN), lambda i: (0, 0)),       # bias:   resident
        ]
        out_specs = pl.BlockSpec((TM, TN), lambda i: (i, 0))
        dim_sem = ("parallel",)
    else:
        # Rare very-wide-hidden case: N outer so weight/bias keep the same block index
        # across the whole M sweep (re-DMA skipped).
        grid = (n_steps, m_steps)
        in_specs = [
            pl.BlockSpec((TM, K_pad), lambda j, i: (i, 0)),
            pl.BlockSpec((TN, K_pad), lambda j, i: (j, 0)),
            pl.BlockSpec((1, TN), lambda j, i: (0, j)),
        ]
        out_specs = pl.BlockSpec((TM, TN), lambda j, i: (i, j))
        dim_sem = ("parallel", "parallel")

    out_itemsize = jnp.dtype(out_dtype).itemsize
    out = pl.pallas_call(
        _patch_embed_kernel,
        out_shape=jax.ShapeDtypeStruct((M_pad, N_pad), out_dtype),
        grid=grid,
        in_specs=in_specs,
        out_specs=out_specs,
        compiler_params=pltpu.CompilerParams(
            dimension_semantics=dim_sem,
            vmem_limit_bytes=32 * 1024 * 1024,   # v5e scoped default is only 16 MiB
        ),
        cost_estimate=pl.CostEstimate(
            flops=2 * M_pad * K_pad * N_pad,
            bytes_accessed=(2 * M_pad * K_pad + 2 * N_pad * K_pad
                            + 4 * N_pad + out_itemsize * M_pad * N_pad),
            transcendentals=0,
        ),
    )(patches, w_mat, b_mat)

    return out[:M, :N].reshape(B, num_patches, N)


def reference_patch_embeddings(x, weight, bias, patch_size):
    """Pure-JAX f32 reference: conv2d with kernel=stride=patch, then flatten(2).transpose(1,2)."""
    y = jax.lax.conv_general_dilated(
        x, weight,
        window_strides=(patch_size, patch_size),
        padding="VALID",
        dimension_numbers=("NCHW", "OIHW", "NCHW"),
    ) + bias.reshape(1, -1, 1, 1)
    B, D, Hp, Wp = y.shape
    return jnp.transpose(y.reshape(B, D, Hp * Wp), (0, 2, 1))


if __name__ == "__main__":
    # config from the PyTorch module
    patch_size = 4
    hidden_size = 48
    num_channels = 3
    image_size = 32
    batch = 2

    key = jax.random.PRNGKey(0)
    kx, kw, kb = jax.random.split(key, 3)

    x = jax.random.normal(kx, (batch, num_channels, image_size, image_size), jnp.float32)
    # deterministic synthetic params (Conv2d weight layout: (out, in, kh, kw))
    weight = 0.02 * jax.random.normal(
        kw, (hidden_size, num_channels, patch_size, patch_size), jnp.float32)
    bias = 0.02 * jax.random.normal(kb, (hidden_size,), jnp.float32)

    out = patch_embeddings(x, weight, bias, patch_size)
    out = jax.block_until_ready(out)

    ref = reference_patch_embeddings(x, weight, bias, patch_size)
    assert out.shape == (batch, (image_size // patch_size) ** 2, hidden_size), out.shape
    # bf16 MXU inputs with f32 accumulation -> looser tolerance than a pure-f32 path
    max_err = float(jnp.max(jnp.abs(out - ref)))
    assert jnp.allclose(out, ref, atol=2e-2, rtol=2e-2), max_err

    print("KERNEL_OK")
</pallas_src>

<mosaic_0001>
module attributes {stable_mosaic.version = 11 : i64} {
  func.func @_patch_embed_kernel(%arg0: i32, %arg1: memref<64x128xbf16, #tpu.memory_space<vmem>>, %arg2: memref<128x128xbf16, #tpu.memory_space<vmem>>, %arg3: memref<1x128xf32, #tpu.memory_space<vmem>>, %arg4: memref<64x128xf32, #tpu.memory_space<vmem>>) attributes {dimension_semantics = [#tpu.dimension_semantics<parallel>], iteration_bounds = array<i64: 2>, scalar_prefetch = 0 : i64, scratch_operands = 0 : i64, tpu.core_type = #tpu.core_type<tc>, window_params = [{transform_indices = @transform_0, window_bounds = array<i64: 64, 128>}, {pipeline_mode = #tpu.pipeline_mode<synchronous>, transform_indices = @transform_1, window_bounds = array<i64: 128, 128>}, {pipeline_mode = #tpu.pipeline_mode<synchronous>, transform_indices = @transform_2, window_bounds = array<i64: 1, 128>}, {transform_indices = @transform_3, window_bounds = array<i64: 64, 128>}]} {
    %c0 = arith.constant 0 : index
    %c0_0 = arith.constant 0 : index
    %0 = vector.load %arg1[%c0, %c0_0] : memref<64x128xbf16, #tpu.memory_space<vmem>>, vector<64x128xbf16>
    %c0_1 = arith.constant 0 : index
    %c0_2 = arith.constant 0 : index
    %1 = vector.load %arg2[%c0_1, %c0_2] : memref<128x128xbf16, #tpu.memory_space<vmem>>, vector<128x128xbf16>
    %cst = arith.constant dense<0.000000e+00> : vector<64x128xf32>
    %2 = tpu.matmul %0, %1, %cst {dimension_numbers = #tpu.dot_dimension_numbers<[1], [1], [0], [0], [0, 0, 1, 0], [], []>} : vector<64x128xbf16>, vector<128x128xbf16>, vector<64x128xf32> -> vector<64x128xf32>
    %c0_3 = arith.constant 0 : index
    %c0_4 = arith.constant 0 : index
    %3 = vector.load %arg3[%c0_3, %c0_4] : memref<1x128xf32, #tpu.memory_space<vmem>>, vector<1x128xf32>
    %4 = vector.broadcast %3 : vector<1x128xf32> to vector<64x128xf32>
    %5 = arith.addf %2, %4 : vector<64x128xf32>
    %c0_5 = arith.constant 0 : index
    %c0_6 = arith.constant 0 : index
    %6 = vector.load %arg4[%c0_5, %c0_6] : memref<64x128xf32, #tpu.memory_space<vmem>>, vector<64x128xf32>
    tpu.vector_store %arg4[%c0_5, %c0_6], %5 {strides = array<i32>} : memref<64x128xf32, #tpu.memory_space<vmem>>, vector<64x128xf32>,
    return
  }
  func.func @transform_0(%arg0: i32) -> (i32, i32) {
    %c0_i32 = arith.constant 0 : i32
    %c0_i32_0 = arith.constant 0 : i32
    return %arg0, %c0_i32 : i32, i32
  }
  func.func @transform_1(%arg0: i32) -> (i32, i32) {
    %c0_i32 = arith.constant 0 : i32
    %c0_i32_0 = arith.constant 0 : i32
    %c0_i32_1 = arith.constant 0 : i32
    return %c0_i32, %c0_i32_0 : i32, i32
  }
  func.func @transform_2(%arg0: i32) -> (i32, i32) {
    %c0_i32 = arith.constant 0 : i32
    %c0_i32_0 = arith.constant 0 : i32
    %c0_i32_1 = arith.constant 0 : i32
    return %c0_i32, %c0_i32_0 : i32, i32
  }
  func.func @transform_3(%arg0: i32) -> (i32, i32) {
    %c0_i32 = arith.constant 0 : i32
    %c0_i32_0 = arith.constant 0 : i32
    return %arg0, %c0_i32 : i32, i32
  }
}

</mosaic_0001>

<bundles_post_ra>
// kernel: patch_embeddings.1
= control target key start
LH: loop header
LB: loop body
LE: loop exit
PB: predicated region body
PF: predicated region fallthrough
CT: control target
= control target key end

     0   :  { %s531_s12 = smov 0   ;;  %s585_s0 = inlined_call_operand.vmem [shape: bf16[128,128], index: 0, kind: input, shape index: {}]   ;;  %s586_s1 = inlined_call_operand.vmem [shape: bf16[128,128], index: 1, kind: input, shape index: {}]   ;;  %s587_s2 = inlined_call_operand.vmem [shape: f32[1,128], index: 2, kind: input, shape index: {}]   ;;  %s588_s3 = inlined_call_operand.vmem [shape: f32[128,128], index: 3, kind: output, shape index: {}]  }
   0x1 LB: > { %s407_s13 = sadd.s32 4294967295, %s509_s12   ;;  %p411_p0 = scmp.ge.s32.totalorder %s509_s12, 1  ;;  %s509_s12 = sphi %s531_s12, %s13_s12  }
   0x2   : > { %p138_p1 = scmp.lt.s32.totalorder %s509_s12, 3 }
   0x4   : > { %p139_p2 = pnand %p411_p0, %p138_p1 }
   0x5   : > { %v491_v0 = vld [vmem:[%s586_s1] sm:$0xff] (!%p139_p2)   ;;  %s412_s16 = sshll.u32 (!%p139_p2), %s407_s13, 3  ;;  %v492_v1 = vld [vmem:[%s586_s1 + $0x8] sm:$0xff] (!%p139_p2)   ;;  %v493_v2 = vld [vmem:[%s586_s1 + $0x10] sm:$0xff] (!%p139_p2)  }
   0x6   : > { %142 = sbr.rel (%p139_p2) target bundleno = 288 (0x120), region = 32  ;;  %p163_p3 = scmp.lt.s32.totalorder (!%p139_p2), %s412_s16, 15  ;;  %443 = vmatprep.subr.bf16.mxu0 (!%p139_p2), %v491_v0  ;;  %467 = vmatprep.subr.bf16.mxu1 (!%p139_p2), %v491_v0  ;;  %v494_v5 = vld [vmem:[%s586_s1 + $0x18] sm:$0xff] (!%p139_p2)   ;;  %v495_v6 = vld [vmem:[%s586_s1 + $0x20] sm:$0xff] (!%p139_p2)   ;;  %v496_v7 = vld [vmem:[%s586_s1 + $0x28] sm:$0xff] (!%p139_p2)  }
   0x7   : > { %444 = vmatpush3.bf16.xpose.msra.mxu0 (!%p139_p2), %v491_v0  ;;  %475 = vmatpush3.bf16.xpose.msra.mxu1 (!%p139_p2), %v491_v0  ;;  %v497_v8 = vld [vmem:[%s586_s1 + $0x30] sm:$0xff] (!%p139_p2)   ;;  %v498_v9 = vld [vmem:[%s586_s1 + $0x38] sm:$0xff] (!%p139_p2)   ;;  %v416_v12 = vld [vmem:[%s587_s2] ss:$0 sm:$0xff] (!%p139_p2) }
   0x8   : > { %445 = vmatprep.subr.bf16.mxu0 (!%p139_p2), %v492_v1  ;;  %468 = vmatprep.subr.bf16.mxu1 (!%p139_p2), %v492_v1 }
   0xd   : > { %s590_s16 = smov (!%p163_p3, %s412_s16), 15 }
   0xe   : > { %s413_s19 = sshll.u32 %s590_s16, 2  ;;  %s415_s8 = sshll.u32 %s590_s16, 3 }
   0xf   : > { %s551_s22 = scalar_lea.vmem %s585_s0, %s413_s19  ;;  %446 = vmatpush3.bf16.xpose.msra.mxu0 %v492_v1  ;;  %476 = vmatpush3.bf16.xpose.msra.mxu1 %v492_v1  ;;  %s172_s14 = scalar_lea.vmem %s588_s3, %s415_s8 }
  0x10   : > { %v499_v3 = vld [vmem:[%s551_s22] sm:$0xff]   ;;  %v500_v4 = vld [vmem:[%s551_s22 + $0x10] sm:$0xff]   ;;  %447 = vmatprep.subr.bf16.mxu0 %v493_v2  ;;  %469 = vmatprep.subr.bf16.mxu1 %v493_v2  ;;  %v501_v10 = vld [vmem:[%s551_s22 + $0x8] sm:$0xff]  }
  0x11   : > { %459 = vmatprep.mubr.bf16.mxu0 %v499_v3  ;;  %463 = vmatprep.mubr.bf16.mxu1 %v500_v4  ;;  %v502_v11 = vld [vmem:[%s551_s22 + $0x18] sm:$0xff]  }
  0x17   : > { %448 = vmatpush3.bf16.xpose.msra.mxu0 %v493_v2  ;;  %477 = vmatpush3.bf16.xpose.msra.mxu1 %v493_v2 }
  0x18   : > { %449 = vmatprep.subr.bf16.mxu0 %v494_v5  ;;  %470 = vmatprep.subr.bf16.mxu1 %v494_v5 }
  0x1f   : > { %450 = vmatpush3.bf16.xpose.msra.mxu0 %v494_v5  ;;  %478 = vmatpush3.bf16.xpose.msra.mxu1 %v494_v5 }
  0x20   : > { %451 = vmatprep.subr.bf16.mxu0 %v495_v6  ;;  %471 = vmatprep.subr.bf16.mxu1 %v495_v6 }
  0x27   : > { %452 = vmatpush3.bf16.xpose.msra.mxu0 %v495_v6  ;;  %479 = vmatpush3.bf16.xpose.msra.mxu1 %v495_v6 }
  0x28   : > { %453 = vmatprep.subr.bf16.mxu0 %v496_v7  ;;  %472 = vmatprep.subr.bf16.mxu1 %v496_v7 }
  0x2f   : > { %454 = vmatpush3.bf16.xpose.msra.mxu0 %v496_v7  ;;  %480 = vmatpush3.bf16.xpose.msra.mxu1 %v496_v7 }
  0x30   : > { %455 = vmatprep.subr.bf16.mxu0 %v497_v8  ;;  %473 = vmatprep.subr.bf16.mxu1 %v497_v8 }
  0x37   : > { %456 = vmatpush3.bf16.xpose.msra.mxu0 %v497_v8  ;;  %481 = vmatpush3.bf16.xpose.msra.mxu1 %v497_v8 }
  0x38   : > { %457 = vmatprep.subr.bf16.mxu0 %v498_v9  ;;  %474 = vmatprep.subr.bf16.mxu1 %v498_v9 }
  0x3f   : > { %458 = vmatpush3.bf16.xpose.msra.mxu0 %v498_v9  ;;  %482 = vmatpush3.bf16.xpose.msra.mxu1 %v498_v9 }
  0x46   : > { %460 = vmatmul.mubr.bf16.vlgmr.msra.gmra.mrb[0].mxu0 %v501_v10  ;;  %464 = vmatmul.mubr.bf16.vlgmr.msra.gmra.mrb[0].mxu1 %v502_v11 }
 0x119   : > { %v461_v13 = vpop.f32.mrb[0].mxu0  ;;  %v465_v14 = vpop.f32.mrb[0].mxu1 }
 0x11a   : > { %v321_v15 = vadd.f32 %v461_v13, %v416_v12  ;;  %v337_v16 = vadd.f32 %v465_v14, %v416_v12  ;;  %v312_v17 = vpop.f32.mrb[1].mxu0  ;;  %v328_v18 = vpop.f32.mrb[1].mxu1 }
 0x11b   : > { %v313_v19 = vadd.f32 %v416_v12, %v312_v17  ;;  %v329_v20 = vadd.f32 %v416_v12, %v328_v18  ;;  %v462_v21 = vpop.f32.mrb[2].mxu0  ;;  %v466_v22 = vpop.f32.mrb[2].mxu1 }
 0x11c   : > { %345 = vst [vmem:[%s172_s14 + $0x10] sm:$0xff] %v321_v15  ;;  %349 = vst [vmem:[%s172_s14 + $0x30] sm:$0xff] %v337_v16  ;;  %v324_v23 = vadd.f32 %v462_v21, %v416_v12  ;;  %v340_v24 = vadd.f32 %v466_v22, %v416_v12  ;;  %v315_v25 = vpop.f32.mrb[3].mxu0  ;;  %v331_v26 = vpop.f32.mrb[3].mxu1 }
 0x11d   : > { %343 = vst [vmem:[%s172_s14] sm:$0xff] %v313_v19  ;;  %347 = vst [vmem:[%s172_s14 + $0x20] sm:$0xff] %v329_v20  ;;  %v316_v27 = vadd.f32 %v416_v12, %v315_v25  ;;  %v332_v28 = vadd.f32 %v416_v12, %v331_v26 }
 0x11e   : > { %346 = vst [vmem:[%s172_s14 + $0x18] sm:$0xff] %v324_v23  ;;  %350 = vst [vmem:[%s172_s14 + $0x38] sm:$0xff] %v340_v24 }
 0x11f   : > { %344 = vst [vmem:[%s172_s14 + $0x8] sm:$0xff] %v316_v27  ;;  %348 = vst [vmem:[%s172_s14 + $0x28] sm:$0xff] %v332_v28 }
 0x120 PF: > { %s13_s12 = sadd.s32 1, %s509_s12  }
 0x121   : > { %p10_p4 = scmp.ge.s32.totalorder %s13_s12, 4  }
 0x123   :  { %12 = sbr.rel (!%p10_p4) target bundleno = 1 (0x1), region = 62 }

</bundles_post_ra>
